<compile_context>
chip_gen: v5e
topology: v5e:2x2
jax: 0.10.0
libtpu: 0.0.40
codegen_flags: <defaults>
</compile_context>

<pallas_src>
import functools

import jax
import jax.numpy as jnp
from jax.experimental import pallas as pl
from jax.experimental.pallas import tpu as pltpu

LAMBDA_VAL = 100.0
LANE = 1024            # lane-dense last dim (multiple of 128)
MAX_BLOCK_ROWS = 256   # 256 x 1024 f32 = 1 MiB per input block
DISC_PAD_VALUE = 1e30  # softplus(-1e30) == 0 exactly in f32


def _round_up(x, m):
    return -(-x // m) * m


def _to_slab(a, lane, row_multiple, pad_value):
    """Flatten to 1-D, pad, and reshape into a lane-dense (rows, lane) slab."""
    flat = a.reshape(-1)
    n = flat.shape[0]
    rows = _round_up(max(-(-n // lane), 1), row_multiple)
    total = rows * lane
    if total != n:
        flat = jnp.pad(flat, (0, total - n), constant_values=pad_value)
    return flat.reshape(rows, lane)


def _generator_loss_kernel(disc_ref, gen_ref, real_ref, out_ref,
                           acc_ref, bce_sc,
                           *, inv_n_disc, inv_n_mask, lambda_val):
    i = pl.program_id(0)

    @pl.when(i == 0)
    def _init():
        acc_ref[...] = jnp.zeros_like(acc_ref)
        # BCE-with-logits vs all-ones target == mean(softplus(-x)).  The disc
        # output is small and resident, so reduce it exactly once here
        # (padded entries of +1e30 contribute exactly 0).
        x = disc_ref[...].astype(jnp.float32)
        sp = jnp.maximum(-x, 0.0) + jnp.log1p(jnp.exp(-jnp.abs(x)))
        bce_sc[0] = jnp.sum(sp)

    # Per-step work is pure VPU: elementwise |diff| accumulated into a
    # block-shaped f32 accumulator; no per-step cross-lane reduction.
    g = gen_ref[...].astype(jnp.float32)
    r = real_ref[...].astype(jnp.float32)
    acc_ref[...] += jnp.abs(g - r)

    @pl.when(i == pl.num_programs(0) - 1)
    def _finalize():
        l1_sum = jnp.sum(acc_ref[...])
        out_ref[0, 0] = (bce_sc[0] * inv_n_disc
                         + lambda_val * (l1_sum * inv_n_mask))


def generator_loss(disc_fake_output, generated_masks, real_masks,
                   lambda_val=LAMBDA_VAL, block_rows=None):
    """Pallas implementation of GeneratorLoss.forward. Returns a scalar."""
    n_disc = disc_fake_output.size
    n_mask = generated_masks.size

    # ---- lane-dense slabs (zero-pad masks, +1e30-pad logits) --------------
    mask_rows = max(-(-n_mask // LANE), 1)
    if block_rows is None:
        block_rows = min(MAX_BLOCK_ROWS, _round_up(mask_rows, 8))
    block_rows = _round_up(block_rows, 8)

    gen2d = _to_slab(generated_masks, LANE, block_rows, 0.0)
    real2d = _to_slab(real_masks, LANE, block_rows, 0.0)
    disc2d = _to_slab(disc_fake_output, LANE, 8, DISC_PAD_VALUE)

    num_blocks = gen2d.shape[0] // block_rows

    kernel = functools.partial(
        _generator_loss_kernel,
        inv_n_disc=1.0 / float(n_disc),
        inv_n_mask=1.0 / float(n_mask),
        lambda_val=float(lambda_val),
    )

    out = pl.pallas_call(
        kernel,
        out_shape=jax.ShapeDtypeStruct((1, 1), jnp.float32),
        grid_spec=pltpu.PrefetchScalarGridSpec(
            num_scalar_prefetch=0,
            grid=(num_blocks,),
            in_specs=[
                # small disc output: full-array block, resident across grid
                pl.BlockSpec(disc2d.shape, lambda i: (0, 0)),
                # masks: tiled + double-buffered by the BlockSpec pipeline
                pl.BlockSpec((block_rows, LANE), lambda i: (i, 0)),
                pl.BlockSpec((block_rows, LANE), lambda i: (i, 0)),
            ],
            out_specs=pl.BlockSpec((1, 1), lambda i: (0, 0),
                                   memory_space=pltpu.SMEM),
            scratch_shapes=[
                pltpu.VMEM((block_rows, LANE), jnp.float32),  # L1 accumulator
                pltpu.SMEM((1,), jnp.float32),                # BCE partial sum
            ],
        ),
        compiler_params=pltpu.CompilerParams(
            dimension_semantics=("arbitrary",),
        ),
    )(disc2d, gen2d, real2d)
    return out[0, 0]


def _reference_loss(disc_fake_output, generated_masks, real_masks,
                    lambda_val=LAMBDA_VAL):
    x = disc_fake_output.astype(jnp.float32)
    bce = jnp.mean(jnp.maximum(-x, 0.0) + jnp.log1p(jnp.exp(-jnp.abs(x))))
    l1 = jnp.mean(jnp.abs(generated_masks.astype(jnp.float32)
                          - real_masks.astype(jnp.float32)))
    return bce + lambda_val * l1


if __name__ == "__main__":
    key = jax.random.PRNGKey(0)
    k1, k2, k3, k4, k5, k6 = jax.random.split(key, 6)

    # --- Test 1: small NCHW shapes, single-block grid ----------------------
    disc_fake_output = jax.random.normal(k1, (2, 1, 16, 16), dtype=jnp.float32)
    generated_masks = jax.random.normal(k2, (2, 1, 16, 16), dtype=jnp.float32)
    real_masks = (jax.random.uniform(k3, (2, 1, 16, 16)) > 0.5).astype(jnp.float32)

    loss = generator_loss(disc_fake_output, generated_masks, real_masks)
    loss = jax.block_until_ready(loss)
    ref = _reference_loss(disc_fake_output, generated_masks, real_masks)
    assert jnp.allclose(loss, ref, rtol=1e-5, atol=1e-5), (loss, ref)

    # --- Test 2: non-lane-aligned sizes + forced multi-block grid ----------
    disc2 = jax.random.normal(k4, (2, 1, 30, 30), dtype=jnp.float32)      # 1800 elems
    gen2 = jax.random.normal(k5, (2, 3, 32, 48), dtype=jnp.float32)       # 9216 elems
    real2 = (jax.random.uniform(k6, (2, 3, 32, 48)) > 0.5).astype(jnp.float32)

    loss2 = generator_loss(disc2, gen2, real2, block_rows=8)  # grid of 2 blocks
    loss2 = jax.block_until_ready(loss2)
    ref2 = _reference_loss(disc2, gen2, real2)
    assert jnp.allclose(loss2, ref2, rtol=1e-5, atol=1e-5), (loss2, ref2)

    print("KERNEL_OK")
</pallas_src>

<mosaic_0001>
module attributes {stable_mosaic.version = 11 : i64} {
  func.func @_generator_loss_kernel(%arg0: i32, %arg1: memref<8x1024xf32, #tpu.memory_space<vmem>>, %arg2: memref<8x1024xf32, #tpu.memory_space<vmem>>, %arg3: memref<8x1024xf32, #tpu.memory_space<vmem>>, %arg4: memref<1x1xf32, #tpu.memory_space<smem>>, %arg5: memref<8x1024xf32, #tpu.memory_space<vmem>>, %arg6: memref<1xf32, #tpu.memory_space<smem>>) attributes {dimension_semantics = [#tpu.dimension_semantics<arbitrary>], iteration_bounds = array<i64: 1>, scalar_prefetch = 0 : i64, scratch_operands = 2 : i64, tpu.core_type = #tpu.core_type<tc>, window_params = [{pipeline_mode = #tpu.pipeline_mode<synchronous>, transform_indices = @transform_0, window_bounds = array<i64: 8, 1024>}, {transform_indices = @transform_1, window_bounds = array<i64: 8, 1024>}, {transform_indices = @transform_2, window_bounds = array<i64: 8, 1024>}, {transform_indices = @transform_3, window_bounds = array<i64: 1, 1>}]} {
    %c0_i32 = arith.constant 0 : i32
    %0 = arith.cmpi eq, %arg0, %c0_i32 : i32
    %1 = arith.extui %0 : i1 to i32
    %c0_i32_0 = arith.constant 0 : i32
    %2 = arith.cmpi ne, %1, %c0_i32_0 : i32
    scf.if %2 {
      %cst = arith.constant 0.000000e+00 : f32
      %13 = vector.broadcast %cst : f32 to vector<8x1024xf32>
      %c0_10 = arith.constant 0 : index
      %c0_11 = arith.constant 0 : index
      %14 = vector.load %arg5[%c0_10, %c0_11] : memref<8x1024xf32, #tpu.memory_space<vmem>>, vector<8x1024xf32>
      tpu.vector_store %arg5[%c0_10, %c0_11], %13 {strides = array<i32>} : memref<8x1024xf32, #tpu.memory_space<vmem>>, vector<8x1024xf32>,
      %c0_12 = arith.constant 0 : index
      %c0_13 = arith.constant 0 : index
      %15 = vector.load %arg1[%c0_12, %c0_13] : memref<8x1024xf32, #tpu.memory_space<vmem>>, vector<8x1024xf32>
      %cst_14 = arith.constant 0.000000e+00 : f32
      %16 = vector.broadcast %cst_14 : f32 to vector<8x1024xf32>
      %17 = arith.subf %16, %15 : vector<8x1024xf32>
      %cst_15 = arith.constant 0.000000e+00 : f32
      %18 = vector.broadcast %cst_15 : f32 to vector<8x1024xf32>
      %19 = arith.maximumf %17, %18 : vector<8x1024xf32>
      %20 = math.absf %15 : vector<8x1024xf32>
      %cst_16 = arith.constant 0.000000e+00 : f32
      %21 = vector.broadcast %cst_16 : f32 to vector<8x1024xf32>
      %22 = arith.subf %21, %20 : vector<8x1024xf32>
      %23 = math.exp %22 : vector<8x1024xf32>
      %24 = math.log1p %23 : vector<8x1024xf32>
      %25 = arith.addf %19, %24 : vector<8x1024xf32>
      %26 = vector.shape_cast %25 : vector<8x1024xf32> to vector<1x8x1024xf32>
      %cst_17 = arith.constant dense<0.000000e+00> : vector<1xf32>
      %27 = vector.multi_reduction <add>, %26, %cst_17 [1, 2] : vector<1x8x1024xf32> to vector<1xf32>
      %28 = vector.shape_cast %27 : vector<1xf32> to vector<1x1x1xf32>
      %29 = vector.extract %28[0, 0, 0] : f32 from vector<1x1x1xf32>
      %c0_18 = arith.constant 0 : index
      %30 = memref.load %arg6[%c0_18] : memref<1xf32, #tpu.memory_space<smem>>
      memref.store %29, %arg6[%c0_18] : memref<1xf32, #tpu.memory_space<smem>>
    } else {
    }
    %c0 = arith.constant 0 : index
    %c0_1 = arith.constant 0 : index
    %3 = vector.load %arg2[%c0, %c0_1] : memref<8x1024xf32, #tpu.memory_space<vmem>>, vector<8x1024xf32>
    %c0_2 = arith.constant 0 : index
    %c0_3 = arith.constant 0 : index
    %4 = vector.load %arg3[%c0_2, %c0_3] : memref<8x1024xf32, #tpu.memory_space<vmem>>, vector<8x1024xf32>
    %c0_4 = arith.constant 0 : index
    %c0_5 = arith.constant 0 : index
    %5 = vector.load %arg5[%c0_4, %c0_5] : memref<8x1024xf32, #tpu.memory_space<vmem>>, vector<8x1024xf32>
    %6 = arith.subf %3, %4 : vector<8x1024xf32>
    %7 = math.absf %6 : vector<8x1024xf32>
    %8 = arith.addf %5, %7 : vector<8x1024xf32>
    %c0_6 = arith.constant 0 : index
    %c0_7 = arith.constant 0 : index
    %9 = vector.load %arg5[%c0_6, %c0_7] : memref<8x1024xf32, #tpu.memory_space<vmem>>, vector<8x1024xf32>
    tpu.vector_store %arg5[%c0_6, %c0_7], %8 {strides = array<i32>} : memref<8x1024xf32, #tpu.memory_space<vmem>>, vector<8x1024xf32>,
    %c0_i32_8 = arith.constant 0 : i32
    %10 = arith.cmpi eq, %arg0, %c0_i32_8 : i32
    %11 = arith.extui %10 : i1 to i32
    %c0_i32_9 = arith.constant 0 : i32
    %12 = arith.cmpi ne, %11, %c0_i32_9 : i32
    scf.if %12 {
      %c0_10 = arith.constant 0 : index
      %c0_11 = arith.constant 0 : index
      %13 = vector.load %arg5[%c0_10, %c0_11] : memref<8x1024xf32, #tpu.memory_space<vmem>>, vector<8x1024xf32>
      %14 = vector.shape_cast %13 : vector<8x1024xf32> to vector<1x8x1024xf32>
      %cst = arith.constant dense<0.000000e+00> : vector<1xf32>
      %15 = vector.multi_reduction <add>, %14, %cst [1, 2] : vector<1x8x1024xf32> to vector<1xf32>
      %16 = vector.shape_cast %15 : vector<1xf32> to vector<1x1x1xf32>
      %17 = vector.extract %16[0, 0, 0] : f32 from vector<1x1x1xf32>
      %c0_12 = arith.constant 0 : index
      %18 = memref.load %arg6[%c0_12] : memref<1xf32, #tpu.memory_space<smem>>
      %cst_13 = arith.constant 0.001953125 : f32
      %19 = arith.mulf %18, %cst_13 : f32
      %cst_14 = arith.constant 0.001953125 : f32
      %20 = arith.mulf %17, %cst_14 : f32
      %cst_15 = arith.constant 1.000000e+02 : f32
      %21 = arith.mulf %cst_15, %20 : f32
      %22 = arith.addf %19, %21 : f32
      %c0_16 = arith.constant 0 : index
      %c0_17 = arith.constant 0 : index
      %23 = memref.load %arg4[%c0_16, %c0_17] : memref<1x1xf32, #tpu.memory_space<smem>>
      memref.store %22, %arg4[%c0_16, %c0_17] : memref<1x1xf32, #tpu.memory_space<smem>>
    } else {
    }
    return
  }
  func.func @transform_0(%arg0: i32) -> (i32, i32) {
    %c0_i32 = arith.constant 0 : i32
    %c0_i32_0 = arith.constant 0 : i32
    %c0_i32_1 = arith.constant 0 : i32
    return %c0_i32, %c0_i32_0 : i32, i32
  }
  func.func @transform_1(%arg0: i32) -> (i32, i32) {
    %c0_i32 = arith.constant 0 : i32
    %c0_i32_0 = arith.constant 0 : i32
    return %arg0, %c0_i32 : i32, i32
  }
  func.func @transform_2(%arg0: i32) -> (i32, i32) {
    %c0_i32 = arith.constant 0 : i32
    %c0_i32_0 = arith.constant 0 : i32
    return %arg0, %c0_i32 : i32, i32
  }
  func.func @transform_3(%arg0: i32) -> (i32, i32) {
    %c0_i32 = arith.constant 0 : i32
    %c0_i32_0 = arith.constant 0 : i32
    %c0_i32_1 = arith.constant 0 : i32
    return %c0_i32, %c0_i32_0 : i32, i32
  }
}

</mosaic_0001>

<bundles_post_ra>
// kernel: tpu_custom_call.1
= control target key start
LH: loop header
LB: loop body
LE: loop exit
PB: predicated region body
PF: predicated region fallthrough
CT: control target
= control target key end

     0   :  { %8 = vsyncpa [#allocation5], 0  ;;  %s594_s0 = inlined_call_operand.hbm [shape: f32[8,1024], index: 0, kind: input, shape index: {}]   ;;  %s595_s1 = inlined_call_operand.hbm [shape: f32[8,1024], index: 1, kind: input, shape index: {}]   ;;  %s596_s2 = inlined_call_operand.hbm [shape: f32[8,1024], index: 2, kind: input, shape index: {}]   ;;  %s597_s3 = inlined_call_operand.hbm [shape: f32[1,1], index: 3, kind: output, shape index: {}]  }
   0x1   :  { %9 = vsyncpa [#allocation8], 0  ;;  %s27_s14 = sshll.u32 %s595_s1, 4  ;;  %s28_s14 = int_to_ptr.hbm [resolvable:$true] %s27_s14 }
   0x2   :  { %10 = vsyncpa [#allocation6], 0  ;;  %s459_s15 = smov [#allocation7]   ;;  %s16_s19 = sshll.u32 %s594_s0, 4  ;;  %s17_s19 = int_to_ptr.hbm [resolvable:$true] %s16_s19 }
   0x3   :  { %s29_s16 = sshll.u32 %s459_s15, 4  ;;  %s460_s20 = smov [#allocation4]   ;;  %s30_s16 = int_to_ptr.vmem [resolvable:$true] %s29_s16 }
   0x4   :  { %32 = dma.hbm_to_vmem [thread:$0]  %s28_s14, 1024, %s30_s16, [#allocation8]  }
   0x5   :  { %s18_s21 = sshll.u32 %s460_s20, 4  ;;  %s38_s24 = sshll.u32 %s596_s2, 4  ;;  %s19_s21 = int_to_ptr.vmem [resolvable:$true] %s18_s21  ;;  %s39_s24 = int_to_ptr.hbm [resolvable:$true] %s38_s24 }
   0x6   :  { %21 = dma.hbm_to_vmem [thread:$0]  %s17_s19, 1024, %s19_s21, [#allocation5]  }
   0x7   :  { %s461_s1 = smov [#allocation9]  }
   0x8   :  { %s40_s25 = sshll.u32 %s461_s1, 4  ;;  %s41_s25 = int_to_ptr.vmem [resolvable:$true] %s40_s25 }
   0x9   :  { %43 = dma.hbm_to_vmem [thread:$0]  %s39_s24, 1024, %s41_s25, [#allocation8]  }
   0xa   :  { %453 = dma.done.wait [#allocation5], 1024  }
   0xb   :  { %454 = vsyncadd [#allocation5], 4294966272 }
   0xc   :  { %455 = dma.done.wait [#allocation8], 2048  }
   0xd   :  { %456 = vsyncadd [#allocation8], 4294965248  ;;  %v68_v0 = vld [vmem:[#allocation4] sm:$0xff]  ;;  %v69_v1 = vld [vmem:[#allocation4 + $0x8] sm:$0xff]  ;;  %s317_s29 = sshll.u32 %s597_s3, 4  ;;  %s462_s6 = smov [#allocation10]   ;;  %s318_s29 = int_to_ptr.hbm [resolvable:$true] %s317_s29 }
   0xe   :  { %v70_v2 = vld [vmem:[#allocation4 + $0x10] sm:$0xff]  ;;  %v71_v3 = vld [vmem:[#allocation4 + $0x18] sm:$0xff]  ;;  %v72_v4 = vld [vmem:[#allocation4 + $0x20] sm:$0xff]  ;;  %v76_v8 = vsub.f32 0.0, %v68_v0  ;;  %v77_v9 = vsub.f32 0.0, %v69_v1 }
   0xf   :  { %v73_v5 = vld [vmem:[#allocation4 + $0x28] sm:$0xff]  ;;  %v74_v6 = vld [vmem:[#allocation4 + $0x30] sm:$0xff]  ;;  %v492_v7 = vld [vmem:[#allocation4 + $0x38] sm:$0xff]  ;;  %v78_v10 = vsub.f32 0.0, %v70_v2  ;;  %v79_v11 = vsub.f32 0.0, %v71_v3  ;;  %v80_v25 = vsub.f32 0.0, %v72_v4 }
  0x10   :  { %v92_v12 = vand.u32 2147483647, %v68_v0  ;;  %v93_v13 = vand.u32 2147483647, %v69_v1  ;;  %v94_v14 = vand.u32 2147483647, %v70_v2 }
  0x11   :  { %v95_v15 = vand.u32 2147483647, %v71_v3  ;;  %v96_v16 = vand.u32 2147483647, %v72_v4  ;;  %v97_v17 = vand.u32 2147483647, %v73_v5 }
  0x12   :  { %v98_v18 = vand.u32 2147483647, %v74_v6  ;;  %v99_v19 = vand.u32 2147483647, %v492_v7  ;;  %v100_v20 = vsub.f32 0.0, %v92_v12  ;;  %v101_v21 = vsub.f32 0.0, %v93_v13 }
  0x13   :  { %v102_v22 = vsub.f32 0.0, %v94_v14  ;;  %v103_v23 = vsub.f32 0.0, %v95_v15  ;;  %v222_v24 = vld [vmem:[#allocation7] sm:$0xff]  ;;  %v104_v26 = vsub.f32 0.0, %v96_v16  ;;  %v105_v27 = vsub.f32 0.0, %v97_v17  ;;  %v223_v28 = vld [vmem:[#allocation7 + $0x8] sm:$0xff] }
  0x14   :  { %v230_v29 = vld [vmem:[#allocation9] sm:$0xff]  ;;  %v231_v30 = vld [vmem:[#allocation9 + $0x8] sm:$0xff]  ;;  %v108_v31 = vmul.f32 1.442695, %v100_v20  ;;  %v110_v32 = vmul.f32 1.442695, %v101_v21 }
  0x15   :  { %v112_v33 = vmul.f32 1.442695, %v102_v22  ;;  %v81_v34 = vsub.f32 0.0, %v73_v5  ;;  %v106_v35 = vsub.f32 0.0, %v98_v18  ;;  %v107_v36 = vsub.f32 0.0, %v99_v19  ;;  %v224_v46 = vld [vmem:[#allocation7 + $0x10] sm:$0xff] }
  0x16   :  { %v114_v37 = vmul.f32 1.442695, %v103_v23  ;;  %337 = vpow2.f32 %v108_v31  ;;  %v116_v38 = vmul.f32 1.442695, %v104_v26  ;;  %v246_v39 = vsub.f32 %v222_v24, %v230_v29  ;;  %v225_v47 = vld [vmem:[#allocation7 + $0x18] sm:$0xff]  ;;  %v232_v48 = vld [vmem:[#allocation9 + $0x10] sm:$0xff] }
  0x17   :  { %v247_v40 = vsub.f32 %v223_v28, %v231_v30  ;;  %v82_v41 = vsub.f32 0.0, %v74_v6  ;;  %v83_v42 = vsub.f32 0.0, %v492_v7  ;;  %v496_v43 = vmax.f32 %v76_v8, 0.0  ;;  %v502_v51 = vld [vmem:[#allocation7 + $0x20] sm:$0xff]  ;;  %v233_v52 = vld [vmem:[#allocation9 + $0x18] sm:$0xff]  ;;  %v227_v18 = vld [vmem:[#allocation7 + $0x28] sm:$0xff] }
  0x18   :  { %339 = vpow2.f32 %v110_v32  ;;  %v498_v44 = vmax.f32 %v77_v9, 0.0  ;;  %v118_v45 = vmul.f32 1.442695, %v105_v27  ;;  %v500_v49 = vmax.f32 %v78_v10, 0.0  ;;  %v504_v53 = vld [vmem:[#allocation9 + $0x20] sm:$0xff] }
  0x19   :  { %341 = vpow2.f32 %v112_v33  ;;  %v120_v50 = vmul.f32 1.442695, %v106_v35  ;;  %v122_v54 = vmul.f32 1.442695, %v107_v36  ;;  %v254_v55 = vand.u32 2147483647, %v246_v39 }
  0x1a   :  { %343 = vpow2.f32 %v114_v37  ;;  %v255_v56 = vand.u32 2147483647, %v247_v40  ;;  %v506_v57 = vmax.f32 %v79_v11, 0.0  ;;  %v508_v58 = vmax.f32 %v80_v25, 0.0 }
  0x1b   :  { %345 = vpow2.f32 %v116_v38  ;;  %v510_v59 = vmax.f32 %v81_v34, 0.0  ;;  %v248_v60 = vsub.f32 %v224_v46, %v232_v48  ;;  %v512_v62 = vmax.f32 %v82_v41, 0.0 }
  0x1c   :  { %v338_v61 = vpop.eup %337  ;;  %347 = vpow2.f32 %v118_v45  ;;  %v249_v63 = vsub.f32 %v225_v47, %v233_v52  ;;  %v250_v0 = vsub.f32 %v502_v51, %v504_v53  ;;  %v516_v9 = vadd.f32 %v255_v56, %v254_v55 }
  0x1d   :  { %349 = vpow2.f32 %v120_v50  ;;  %v124_v2 = vadd.f32 1.0, %v338_v61  ;;  %v127_v3 = vmul.f32 -0.5, %v338_v61  ;;  %v130_v4 = vand.u32 2147483647, %v338_v61 }
  0x1e   :  { %v340_v1 = vpop.eup %339  ;;  %351 = vpow2.f32 %v122_v54  ;;  %v518_v13 = vand.u32 2147483647, %v248_v60  ;;  %v524_v20 = vand.u32 2147483647, %v249_v63 }
  0x1f   :  { %v342_v5 = vpop.eup %341  ;;  %v133_v6 = vadd.f32 1.0, %v340_v1  ;;  %v136_v8 = vmul.f32 -0.5, %v340_v1  ;;  %353 = vlog2.f32 %v124_v2  ;;  %v139_v11 = vand.u32 2147483647, %v340_v1 }
  0x20   :  { %v344_v10 = vpop.eup %343  ;;  %v142_v12 = vadd.f32 1.0, %v342_v5  ;;  %v128_v15 = vadd.f32 1.0, %v127_v3  ;;  %v145_v17 = vmul.f32 -0.5, %v342_v5  ;;  %vm520_vm0 = vcmp.lt.f32.partialorder %v130_v4, 0.0004427343 }
  0x21   :  { %v346_v14 = vpop.eup %345  ;;  %355 = vlog2.f32 %v133_v6  ;;  %v137_v16 = vadd.f32 1.0, %v136_v8  ;;  %v151_v19 = vadd.f32 1.0, %v344_v10  ;;  %v148_v23 = vand.u32 2147483647, %v342_v5 }
  0x22   :  { %357 = vlog2.f32 %v142_v12  ;;  %v348_v21 = vpop.eup %347  ;;  %v146_v22 = vadd.f32 1.0, %v145_v17  ;;  %v154_v24 = vmul.f32 -0.5, %v344_v10  ;;  %v157_v25 = vand.u32 2147483647, %v344_v10 }
  0x23   :  { %v526_v26 = vpop.eup %349  ;;  %vm528_vm1 = vcmp.lt.f32.partialorder %v139_v11, 0.0004427343  ;;  %359 = vlog2.f32 %v151_v19  ;;  %v160_v28 = vadd.f32 1.0, %v346_v14  ;;  %v163_v29 = vmul.f32 -0.5, %v346_v14  ;;  %v235_v19 = vld [vmem:[#allocation9 + $0x28] sm:$0xff] }
  0x24   :  { %v532_v30 = vpop.eup %351  ;;  %v129_v31 = vmul.f32 %v338_v61, %v128_v15  ;;  %v138_v32 = vmul.f32 %v340_v1, %v137_v16  ;;  %v155_v33 = vadd.f32 1.0, %v154_v24  ;;  %v166_v34 = vand.u32 2147483647, %v346_v14 }
  0x25   :  { %v354_v35 = vpop.eup %353  ;;  %361 = vlog2.f32 %v160_v28  ;;  %v164_v36 = vadd.f32 1.0, %v163_v29  ;;  %v169_v37 = vadd.f32 1.0, %v348_v21  ;;  %v172_v38 = vmul.f32 -0.5, %v348_v21 }
  0x26   :  { %v126_v40 = vmul.f32 0.6931472, %v354_v35  ;;  %v147_v41 = vmul.f32 %v342_v5, %v146_v22  ;;  %vm534_vm2 = vcmp.lt.f32.partialorder %v148_v23, 0.0004427343  ;;  %vm538_vm3 = vcmp.lt.f32.partialorder %v157_v25, 0.0004427343 }
  0x27   :  { %v356_v39 = vpop.eup %355  ;;  %vm542_vm4 = vcmp.lt.f32.partialorder %v166_v34, 0.0004427343  ;;  %363 = vlog2.f32 %v169_v37  ;;  %v173_v52 = vadd.f32 1.0, %v172_v38  ;;  %v156_v55 = vmul.f32 %v344_v10, %v155_v33  ;;  %v228_v37 = vld [vmem:[#allocation7 + $0x30] sm:$0xff] }
  0x28   :  { %v358_v47 = vpop.eup %357  ;;  %v135_v48 = vmul.f32 0.6931472, %v356_v39  ;;  %v175_v56 = vand.u32 2147483647, %v348_v21  ;;  %v178_v60 = vadd.f32 1.0, %v526_v26  ;;  %v132_v63 = vsel %vm520_vm0, %v129_v31, %v126_v40  ;;  %v236_v38 = vld [vmem:[#allocation9 + $0x30] sm:$0xff] }
  0x29   :  { %v144_v54 = vmul.f32 0.6931472, %v358_v47  ;;  %v360_v61 = vpop.eup %359  ;;  %v165_v2 = vmul.f32 %v346_v14, %v164_v36  ;;  %v181_v3 = vmul.f32 -0.5, %v526_v26  ;;  %v174_v5 = vmul.f32 %v348_v21, %v173_v52  ;;  %v237_v52 = vld [vmem:[#allocation9 + $0x38] sm:$0xff] }
  0x2a   :  { %v141_v1 = vsel %vm528_vm1, %v138_v32, %v135_v48  ;;  %v153_v4 = vmul.f32 0.6931472, %v360_v61  ;;  %365 = vlog2.f32 %v178_v60  ;;  %v187_v6 = vadd.f32 1.0, %v532_v30 }
  0x2b   :  { %v362_v8 = vpop.eup %361  ;;  %v150_v10 = vsel %vm534_vm2, %v147_v41, %v144_v54  ;;  %v182_v11 = vadd.f32 1.0, %v181_v3  ;;  %v184_v12 = vand.u32 2147483647, %v526_v26  ;;  %v190_v15 = vmul.f32 -0.5, %v532_v30 }
  0x2c   :  { %v159_v16 = vsel %vm538_vm3, %v156_v55, %v153_v4  ;;  %v162_v14 = vmul.f32 0.6931472, %v362_v8  ;;  %367 = vlog2.f32 %v187_v6  ;;  %v196_v17 = vadd.f32 %v132_v63, %v496_v43 }
  0x2d   :  { %v364_v21 = vpop.eup %363  ;;  %vm560_vm5 = vcmp.lt.f32.partialorder %v175_v56, 0.0004427343  ;;  %v191_v23 = vadd.f32 1.0, %v190_v15  ;;  %v197_v24 = vadd.f32 %v141_v1, %v498_v44  ;;  %v290_v25 = vadd.f32 %v516_v9, %v518_v13 }
  0x2e   :  { %v168_v27 = vsel %vm542_vm4, %v165_v2, %v162_v14  ;;  %v171_v28 = vmul.f32 0.6931472, %v364_v21  ;;  %v193_v29 = vand.u32 2147483647, %v532_v30  ;;  %v198_v43 = vadd.f32 %v150_v10, %v500_v49 }
  0x2f   :  { %v183_v31 = vmul.f32 %v526_v26, %v182_v11  ;;  %v199_v32 = vadd.f32 %v159_v16, %v506_v57  ;;  %v204_v33 = vadd.f32 %v197_v24, %v196_v17  ;;  %v251_v34 = vsub.f32 %v227_v18, %v235_v19 }
  0x30   :  { %v366_v35 = vpop.eup %365  ;;  %v177_v44 = vsel %vm560_vm5, %v174_v5, %v171_v28  ;;  %vm575_vm6 = vcmp.lt.f32.partialorder %v184_v12, 0.0004427343  ;;  %v192_v13 = vmul.f32 %v532_v30, %v191_v23  ;;  %v258_v49 = vand.u32 2147483647, %v250_v0 }
  0x31   :  { %v180_v36 = vmul.f32 0.6931472, %v366_v35  ;;  %v200_v26 = vadd.f32 %v168_v27, %v508_v58  ;;  %v205_v57 = vadd.f32 %v204_v33, %v198_v43  ;;  %v291_v39 = vadd.f32 %v290_v25, %v524_v20  ;;  %v229_v20 = vld [vmem:[#allocation7 + $0x38] sm:$0xff] }
  0x32   :  { %v368_v40 = vpop.eup %367  ;;  %v91_v41 = vmax.f32 %v83_v42, 0.0  ;;  %vm194_vm7 = vcmp.lt.f32.partialorder %v193_v29, 0.0004427343  ;;  %v201_v51 = vadd.f32 %v177_v44, %v510_v59  ;;  %v252_v0 = vsub.f32 %v228_v37, %v236_v38 }
  0x33   :  { %v186_v30 = vsel %vm575_vm6, %v183_v31, %v180_v36  ;;  %v189_v45 = vmul.f32 0.6931472, %v368_v40  ;;  %v206_v53 = vadd.f32 %v205_v57, %v199_v32  ;;  %v259_v46 = vand.u32 2147483647, %v251_v34 }
  0x34   :  { %v202_v47 = vadd.f32 %v186_v30, %v512_v62  ;;  %v292_v50 = vadd.f32 %v291_v39, %v258_v49  ;;  %v253_v55 = vsub.f32 %v229_v20, %v237_v52  ;;  %v260_v56 = vand.u32 2147483647, %v252_v0 }
  0x35   :  { %v195_v58 = vsel %vm194_vm7, %v192_v13, %v189_v45  ;;  %v207_v48 = vadd.f32 %v206_v53, %v200_v26 }
  0x36   :  { %v203_v54 = vadd.f32 %v195_v58, %v91_v41  ;;  %v293_v60 = vadd.f32 %v292_v50, %v259_v46  ;;  %v261_v63 = vand.u32 2147483647, %v253_v55 }
  0x37   :  { %v208_v7 = vadd.f32 %v207_v48, %v201_v51 }
  0x38   :  { %v294_v59 = vadd.f32 %v293_v60, %v260_v56 }
  0x39   :  { %v209_v42 = vadd.f32 %v208_v7, %v202_v47 }
  0x3a   :  { %v295_v1 = vadd.f32 %v294_v59, %v261_v63 }
  0x3b   :  { %v210_v61 = vadd.f32 %v209_v42, %v203_v54 }
  0x3d   :  { %211 = vadd.xlane.f32.xlu0 %v210_v61 }
  0x45   :  { %296 = vadd.xlane.f32.xlu0 %v295_v1 }
  0xb0   :  { %v212_v2 = vpop.xlane.xlu0 %211 }
  0xb1   :  { %v213_v3 = vrot.slane %v212_v2, 4 }
  0xb3   :  { %v214_v4 = vadd.f32 %v213_v3, %v212_v2 }
  0xb5   :  { %v215_v62 = vrot.slane %v214_v4, 2 }
  0xb7   :  { %v216_v5 = vadd.f32 %v215_v62, %v214_v4 }
  0xb8   :  { %v297_v6 = vpop.xlane.xlu0 %296 }
  0xb9   :  { %v298_v8 = vrot.slane %v297_v6, 4  ;;  %v217_v10 = vrot.slane %v216_v5, 1 }
  0xbb   :  { %v299_v11 = vadd.f32 %v298_v8, %v297_v6  ;;  %v218_v12 = vadd.f32 %v217_v10, %v216_v5 }
  0xbd   :  { %v300_v15 = vrot.slane %v299_v11, 2  ;;  %329 = vpush %v218_v12 }
  0xbf   :  { %v301_v16 = vadd.f32 %v300_v15, %v299_v11 }
  0xc1   :  { %v302_v14 = vrot.slane %v301_v16, 1 }
  0xc3   :  { %v303_v17 = vadd.f32 %v302_v14, %v301_v16 }
  0xc5   :  { %331 = vpush %v303_v17 }
  0xee   :  { %s330_s0 = spop %329 }
  0xef   :  { %s306_s30 = smul.f32 0.001953125, %s330_s0 }
  0xf6   :  { %s332_s2 = spop %331 }
  0xf7   :  { %s307_s26 = smul.f32 0.001953125, %s332_s2 }
  0xf9   :  { %s308_s4 = smul.f32 100.0, %s307_s26 }
  0xfb   :  { %s309_s5 = sadd.f32 %s308_s4, %s306_s30 }
  0xfd   :  { %311 = sst [smem:[#allocation10]] %s309_s5 }
  0xfe   :  { %320 = dma.smem_to_hbm %s462_s6, 16, %s318_s29, [#allocation6]  }
  0xff   :  { %457 = dma.done.wait [#allocation6], 16  }
 0x100   :  { %458 = vsyncadd [#allocation6], 4294967280 }
 0x101   :  { %325 = sfence }
 0x102   :  { %326 = vsyncpa [#allocation5], 1 }
 0x103   :  { %327 = vsyncpa [#allocation8], 1 }
 0x104   :  { %328 = vsyncpa [#allocation6], 1 }

</bundles_post_ra>
